<compile_context>
chip_gen: v6e
topology: v6e:2x2x1
jax: 0.10.0
libtpu: 0.0.40
codegen_flags: <defaults>
</compile_context>

<pallas_src>
import functools

import jax
import jax.numpy as jnp
from jax.experimental import pallas as pl
from jax.experimental.pallas import tpu as pltpu

KERNEL_SIZE = 7
PAD = KERNEL_SIZE // 2
LANE = 128


def _round_up(v, m):
    return (v + m - 1) // m * m


# --------------------------------------------------------------------------- #
# Kernels
# --------------------------------------------------------------------------- #
def _sa_kernel_single(w_ref, x_ref, o_ref, *, L, TL):
    """Whole L row fits in one tile: no halo slabs needed."""
    # w_ref: SMEM (2, K) f32  (row 0 already scaled by 1/C)
    # x_ref: VMEM (C, TL)     native dtype; o_ref: VMEM (C, TL)
    x = x_ref[...]
    sum_c = jnp.sum(x.astype(jnp.float32), axis=0, keepdims=True)    # (1, TL) f32
    mx_c = jnp.max(x, axis=0, keepdims=True).astype(jnp.float32)     # exact for bf16

    lane = jax.lax.broadcasted_iota(jnp.int32, (1, TL), 1)

    def tap(row, d):
        # Lane i of the result holds row[i + d], zero outside [0, L) (== the
        # zero padding PyTorch's conv applies to the pooled rows).
        if d == 0:
            return row
        shifted = pltpu.roll(row, shift=(-d) % TL, axis=1)            # XLU rotate
        g = lane + d
        return jnp.where((g >= 0) & (g < L), shifted, 0.0)

    # Hoist the 2*K SMEM scalar reads out of the unrolled accumulation loop.
    w_avg = [w_ref[0, k] for k in range(KERNEL_SIZE)]
    w_max = [w_ref[1, k] for k in range(KERNEL_SIZE)]

    conv = jnp.zeros((1, TL), jnp.float32)
    for k in range(KERNEL_SIZE):                                      # fully unrolled
        d = k - PAD
        conv = conv + w_avg[k] * tap(sum_c, d) + w_max[k] * tap(mx_c, d)

    attn = jax.nn.sigmoid(conv)                                       # (1, TL), EUP
    o_ref[...] = (attn.astype(x.dtype) * x).astype(o_ref.dtype)


def _sa_kernel_halo(w_ref, x_ref, xl_ref, xr_ref, o_ref, *, L, TL):
    """Multi-tile case: 7-tap halo handled via two clamped 128-wide neighbour slabs."""
    # w_ref : SMEM (2, K) f32   (row 0 already scaled by 1/C)
    # x_ref : VMEM (C, TL)      current L-tile of x[b]
    # xl_ref: VMEM (C, 128)     slab just left of the tile (clamped at the edge)
    # xr_ref: VMEM (C, 128)     slab just right of the tile (clamped at the edge)
    j = pl.program_id(1)
    tile_start = j * TL

    x = x_ref[...]
    sum_c = jnp.sum(x.astype(jnp.float32), axis=0, keepdims=True)     # (1, TL)
    mx_c = jnp.max(x, axis=0, keepdims=True).astype(jnp.float32)

    xl = xl_ref[...]
    xr = xr_ref[...]
    sum_l = jnp.sum(xl.astype(jnp.float32), axis=0, keepdims=True)    # (1, 128)
    mx_l = jnp.max(xl, axis=0, keepdims=True).astype(jnp.float32)
    sum_r = jnp.sum(xr.astype(jnp.float32), axis=0, keepdims=True)
    mx_r = jnp.max(xr, axis=0, keepdims=True).astype(jnp.float32)

    # Extend halo rows to tile width once (hoisted out of the tap loop):
    # left-neighbour values live at lanes [TL-128, TL), right-neighbour at [0, 128).
    if TL > LANE:
        zpad = jnp.zeros((1, TL - LANE), jnp.float32)
        ext_l_sum = jnp.concatenate([zpad, sum_l], axis=-1)
        ext_l_mx = jnp.concatenate([zpad, mx_l], axis=-1)
        ext_r_sum = jnp.concatenate([sum_r, zpad], axis=-1)
        ext_r_mx = jnp.concatenate([mx_r, zpad], axis=-1)
    else:
        ext_l_sum, ext_l_mx = sum_l, mx_l
        ext_r_sum, ext_r_mx = sum_r, mx_r

    lane = jax.lax.broadcasted_iota(jnp.int32, (1, TL), 1)

    def tap(row, ext_l, ext_r, d):
        # Lane i holds the pooled value at global column (tile_start + i + d),
        # zero outside [0, L).
        if d == 0:
            return row
        s = (-d) % TL
        shifted = pltpu.roll(row, shift=s, axis=1)                    # XLU rotate
        if d > 0:
            fill = pltpu.roll(ext_r, shift=s, axis=1)
            inside = lane < (TL - d)
        else:
            fill = pltpu.roll(ext_l, shift=s, axis=1)
            inside = lane >= (-d)
        val = jnp.where(inside, shifted, fill)
        g = tile_start + lane + d
        return jnp.where((g >= 0) & (g < L), val, 0.0)

    w_avg = [w_ref[0, k] for k in range(KERNEL_SIZE)]
    w_max = [w_ref[1, k] for k in range(KERNEL_SIZE)]

    conv = jnp.zeros((1, TL), jnp.float32)
    for k in range(KERNEL_SIZE):
        d = k - PAD
        conv = conv + w_avg[k] * tap(sum_c, ext_l_sum, ext_r_sum, d) \
                    + w_max[k] * tap(mx_c, ext_l_mx, ext_r_mx, d)

    attn = jax.nn.sigmoid(conv)
    o_ref[...] = (attn.astype(x.dtype) * x).astype(o_ref.dtype)


# --------------------------------------------------------------------------- #
# Wrapper
# --------------------------------------------------------------------------- #
def spatial_attention(x, w, *, block_l=2048, interpret=False):
    """x: (B, C, L); w: (1, 2, K) Conv1d weight (out=1, in=2, K). Returns (B, C, L)."""
    B, C, L = x.shape
    assert w.shape == (1, 2, KERNEL_SIZE)
    itemsize = jnp.dtype(x.dtype).itemsize

    # ---- generation-aware VMEM budget ---------------------------------------
    try:
        vmem_cap = int(pltpu.get_tpu_info().vmem_capacity_bytes)
    except Exception:
        vmem_cap = 64 * 1024 * 1024
    if vmem_cap >= 100 * 1024 * 1024:            # v5e / v6e: 128 MiB VMEM
        budget = 56 * 1024 * 1024
        vmem_limit = 96 * 1024 * 1024
    else:                                        # v7x: 64 MiB VMEM per TC
        budget = 22 * 1024 * 1024
        vmem_limit = 44 * 1024 * 1024

    # VMEM bytes per lane column: double-buffered in + out tiles, the transient
    # f32 reduction copy, plus slack for the (1, TL) f32 rows.
    per_col = 4 * C * itemsize + 4 * C + 64
    halo_fixed = 4 * C * LANE * itemsize         # 2 halo slabs x 2 buffers
    tl_cap = max(LANE,
                 (max(budget - halo_fixed, LANE * per_col) // per_col) // LANE * LANE)

    # ---- choose the L tile ----------------------------------------------------
    L128 = _round_up(L, LANE)
    NB = L128 // LANE                            # number of 128-lane blocks
    block_l_r = max(LANE, (block_l // LANE) * LANE)
    dmax = max(1, min(block_l_r, tl_cap, L128) // LANE)
    if B == 1 and NB >= 2:
        dmax = min(dmax, (NB + 1) // 2)          # keep >= 2 grid steps (v7x megacore)

    # Prefer a tile width that divides L128 (no pad beyond 128-alignment).
    d = 1
    for cand in range(min(dmax, NB), 0, -1):
        if NB % cand == 0:
            d = cand
            break
    if NB > dmax and d < dmax // 2:              # pathological divisors: accept a pad
        d = dmax
    TL = d * LANE
    num_tiles = pl.cdiv(L128, TL)
    L_pad = num_tiles * TL
    NB_pad = L_pad // LANE
    TLB = TL // LANE

    x_p = jnp.pad(x, ((0, 0), (0, 0), (0, L_pad - L))) if L_pad != L else x

    # Conv weights as an SMEM scalar table; fold 1/C into the avg row so the
    # kernel uses a plain channel sum.
    w2 = w.reshape(2, KERNEL_SIZE).astype(jnp.float32)
    w2 = w2 * jnp.array([[1.0 / C], [1.0]], jnp.float32)

    if num_tiles == 1:
        kernel = functools.partial(_sa_kernel_single, L=L, TL=TL)
        grid = (B,)
        in_specs = [
            pl.BlockSpec(memory_space=pltpu.SMEM),                    # conv weights
            pl.BlockSpec((None, C, TL), lambda b: (b, 0, 0)),         # x tile
        ]
        out_specs = pl.BlockSpec((None, C, TL), lambda b: (b, 0, 0))
        dim_sem = ("parallel",)
        args = (w2, x_p)
    else:
        kernel = functools.partial(_sa_kernel_halo, L=L, TL=TL)
        grid = (B, num_tiles)
        in_specs = [
            pl.BlockSpec(memory_space=pltpu.SMEM),                    # conv weights
            pl.BlockSpec((None, C, TL), lambda b, j: (b, 0, j)),      # x tile
            pl.BlockSpec((None, C, LANE),                             # left halo slab
                         lambda b, j: (b, 0, jnp.maximum(j * TLB - 1, 0))),
            pl.BlockSpec((None, C, LANE),                             # right halo slab
                         lambda b, j: (b, 0, jnp.minimum((j + 1) * TLB, NB_pad - 1))),
        ]
        out_specs = pl.BlockSpec((None, C, TL), lambda b, j: (b, 0, j))
        dim_sem = ("parallel", "parallel")
        args = (w2, x_p, x_p, x_p)

    # Bandwidth-bound cost hint for XLA's scheduler.
    halo_bytes = 2 * B * num_tiles * C * LANE * itemsize if num_tiles > 1 else 0
    cost = pl.CostEstimate(
        flops=int(B * L_pad * (3 * C + 4 * KERNEL_SIZE)),
        transcendentals=int(B * L_pad),
        bytes_accessed=int(2 * B * C * L_pad * itemsize + halo_bytes + w2.size * 4),
    )

    out = pl.pallas_call(
        kernel,
        out_shape=jax.ShapeDtypeStruct((B, C, L_pad), x.dtype),
        grid_spec=pltpu.PrefetchScalarGridSpec(
            num_scalar_prefetch=0,
            grid=grid,
            in_specs=in_specs,
            out_specs=out_specs,
        ),
        compiler_params=pltpu.CompilerParams(
            dimension_semantics=dim_sem,
            vmem_limit_bytes=vmem_limit,
        ),
        cost_estimate=cost,
        interpret=interpret,
    )(*args)

    if L_pad != L:
        out = out[:, :, :L]
    return out


def spatial_attention_ref(x, w):
    """Plain-JAX reference mirroring the PyTorch module (for validation)."""
    avg = jnp.mean(x, axis=1, keepdims=True)
    mx = jnp.max(x, axis=1, keepdims=True)
    cat = jnp.concatenate([avg, mx], axis=1)                          # (B, 2, L)
    conv = jax.lax.conv_general_dilated(
        cat, w, window_strides=(1,), padding=[(PAD, PAD)],
        dimension_numbers=("NCH", "OIH", "NCH"),
        precision=jax.lax.Precision.HIGHEST)                          # (B, 1, L)
    return jax.nn.sigmoid(conv) * x


if __name__ == "__main__":
    key = jax.random.PRNGKey(0)
    kx, kw, kx2, kx4 = jax.random.split(key, 4)

    # Deterministic Conv1d(2, 1, 7, bias=False) weight (PyTorch-style uniform,
    # bound 1/sqrt(fan_in), fan_in = 2 * 7 = 14).
    bound = 1.0 / jnp.sqrt(14.0)
    w = jax.random.uniform(kw, (1, 2, KERNEL_SIZE), jnp.float32,
                           minval=-bound, maxval=bound)

    # Case 1: small shapes from the module spec (single-tile, no-halo kernel).
    B, C, L = 2, 4, 16
    x = jax.random.normal(kx, (B, C, L), dtype=jnp.float32)
    out = jax.block_until_ready(spatial_attention(x, w))
    ref = spatial_attention_ref(x, w)
    assert out.shape == (B, C, L)
    assert jnp.allclose(out, ref, atol=1e-5, rtol=1e-5), "f32 single-tile mismatch"

    # Case 2: multiple L tiles (halo slabs, 128-alignment pad, C % 8 != 0).
    B2, C2, L2 = 2, 5, 300
    x2 = jax.random.normal(kx2, (B2, C2, L2), dtype=jnp.float32)
    out2 = jax.block_until_ready(spatial_attention(x2, w, block_l=128))
    ref2 = spatial_attention_ref(x2, w)
    assert out2.shape == (B2, C2, L2)
    assert jnp.allclose(out2, ref2, atol=1e-4, rtol=1e-4), "f32 multi-tile mismatch"

    # Case 3: bf16 I/O (half HBM traffic); row stats / conv / sigmoid stay f32.
    x3 = x2.astype(jnp.bfloat16)
    out3 = jax.block_until_ready(spatial_attention(x3, w, block_l=128))
    ref3 = spatial_attention_ref(x3.astype(jnp.float32), w)
    assert out3.dtype == jnp.bfloat16
    assert jnp.allclose(out3.astype(jnp.float32), ref3, atol=5e-2, rtol=5e-2), "bf16 mismatch"

    # Case 4: B == 1, 128-aligned L, default block_l -> multi-tile halo path with
    # TL > 128 and NO wrapper-side pad/slice; grid kept >= 2 for megacore.
    B4, C4, L4 = 1, 8, 768
    x4 = jax.random.normal(kx4, (B4, C4, L4), dtype=jnp.float32)
    out4 = jax.block_until_ready(spatial_attention(x4, w))
    ref4 = spatial_attention_ref(x4, w)
    assert out4.shape == (B4, C4, L4)
    assert jnp.allclose(out4, ref4, atol=1e-4, rtol=1e-4), "f32 wide-tile mismatch"

    print("KERNEL_OK")
</pallas_src>

<mosaic_0001>
module attributes {stable_mosaic.version = 11 : i64} {
  func.func @_sa_kernel_single(%arg0: i32, %arg1: memref<2x7xf32, #tpu.memory_space<smem>>, %arg2: memref<1x4x128xf32, #tpu.memory_space<vmem>>, %arg3: memref<1x4x128xf32, #tpu.memory_space<vmem>>) attributes {dimension_semantics = [#tpu.dimension_semantics<parallel>], iteration_bounds = array<i64: 2>, scalar_prefetch = 0 : i64, scratch_operands = 0 : i64, tpu.core_type = #tpu.core_type<tc>, window_params = [{transform_indices = @transform_0, window_bounds = array<i64: 2, 7>}, {transform_indices = @transform_1, window_bounds = array<i64: 1, 4, 128>}, {transform_indices = @transform_2, window_bounds = array<i64: 1, 4, 128>}]} {
    %c0 = arith.constant 0 : index
    %c0_0 = arith.constant 0 : index
    %c0_1 = arith.constant 0 : index
    %0 = vector.load %arg2[%c0, %c0_0, %c0_1] : memref<1x4x128xf32, #tpu.memory_space<vmem>>, vector<1x4x128xf32>
    %1 = vector.shape_cast %0 : vector<1x4x128xf32> to vector<4x128xf32>
    %cst = arith.constant dense<0.000000e+00> : vector<128xf32>
    %2 = vector.multi_reduction <add>, %1, %cst [0] : vector<4x128xf32> to vector<128xf32>
    %3 = vector.shape_cast %2 : vector<128xf32> to vector<1x128xf32>
    %cst_2 = arith.constant dense<0xFF800000> : vector<128xf32>
    %4 = vector.multi_reduction <maximumf>, %1, %cst_2 [0] : vector<4x128xf32> to vector<128xf32>
    %5 = vector.shape_cast %4 : vector<128xf32> to vector<1x128xf32>
    %6 = tpu.iota {dimensions = array<i32: 1>} : vector<1x128xi32>
    %c0_3 = arith.constant 0 : index
    %c0_4 = arith.constant 0 : index
    %7 = memref.load %arg1[%c0_3, %c0_4] : memref<2x7xf32, #tpu.memory_space<smem>>
    %c0_5 = arith.constant 0 : index
    %c1 = arith.constant 1 : index
    %8 = memref.load %arg1[%c0_5, %c1] : memref<2x7xf32, #tpu.memory_space<smem>>
    %c0_6 = arith.constant 0 : index
    %c2 = arith.constant 2 : index
    %9 = memref.load %arg1[%c0_6, %c2] : memref<2x7xf32, #tpu.memory_space<smem>>
    %c0_7 = arith.constant 0 : index
    %c3 = arith.constant 3 : index
    %10 = memref.load %arg1[%c0_7, %c3] : memref<2x7xf32, #tpu.memory_space<smem>>
    %c0_8 = arith.constant 0 : index
    %c4 = arith.constant 4 : index
    %11 = memref.load %arg1[%c0_8, %c4] : memref<2x7xf32, #tpu.memory_space<smem>>
    %c0_9 = arith.constant 0 : index
    %c5 = arith.constant 5 : index
    %12 = memref.load %arg1[%c0_9, %c5] : memref<2x7xf32, #tpu.memory_space<smem>>
    %c0_10 = arith.constant 0 : index
    %c6 = arith.constant 6 : index
    %13 = memref.load %arg1[%c0_10, %c6] : memref<2x7xf32, #tpu.memory_space<smem>>
    %c1_11 = arith.constant 1 : index
    %c0_12 = arith.constant 0 : index
    %14 = memref.load %arg1[%c1_11, %c0_12] : memref<2x7xf32, #tpu.memory_space<smem>>
    %c1_13 = arith.constant 1 : index
    %c1_14 = arith.constant 1 : index
    %15 = memref.load %arg1[%c1_13, %c1_14] : memref<2x7xf32, #tpu.memory_space<smem>>
    %c1_15 = arith.constant 1 : index
    %c2_16 = arith.constant 2 : index
    %16 = memref.load %arg1[%c1_15, %c2_16] : memref<2x7xf32, #tpu.memory_space<smem>>
    %c1_17 = arith.constant 1 : index
    %c3_18 = arith.constant 3 : index
    %17 = memref.load %arg1[%c1_17, %c3_18] : memref<2x7xf32, #tpu.memory_space<smem>>
    %c1_19 = arith.constant 1 : index
    %c4_20 = arith.constant 4 : index
    %18 = memref.load %arg1[%c1_19, %c4_20] : memref<2x7xf32, #tpu.memory_space<smem>>
    %c1_21 = arith.constant 1 : index
    %c5_22 = arith.constant 5 : index
    %19 = memref.load %arg1[%c1_21, %c5_22] : memref<2x7xf32, #tpu.memory_space<smem>>
    %c1_23 = arith.constant 1 : index
    %c6_24 = arith.constant 6 : index
    %20 = memref.load %arg1[%c1_23, %c6_24] : memref<2x7xf32, #tpu.memory_space<smem>>
    %cst_25 = arith.constant 0.000000e+00 : f32
    %21 = vector.broadcast %cst_25 : f32 to vector<1x128xf32>
    %c3_i32 = arith.constant 3 : i32
    %22 = tpu.dynamic_rotate %3 by %c3_i32 dim 1 : vector<1x128xf32>, i32 -> vector<1x128xf32>
    %c-3_i32 = arith.constant -3 : i32
    %23 = vector.broadcast %c-3_i32 : i32 to vector<1x128xi32>
    %24 = arith.addi %6, %23 : vector<1x128xi32>
    %c0_i32 = arith.constant 0 : i32
    %25 = vector.broadcast %c0_i32 : i32 to vector<1x128xi32>
    %26 = arith.cmpi sge, %24, %25 : vector<1x128xi32>
    %c16_i32 = arith.constant 16 : i32
    %27 = vector.broadcast %c16_i32 : i32 to vector<1x128xi32>
    %28 = arith.cmpi slt, %24, %27 : vector<1x128xi32>
    %29 = arith.andi %26, %28 : vector<1x128xi1>
    %cst_26 = arith.constant 0.000000e+00 : f32
    %30 = vector.broadcast %cst_26 : f32 to vector<1x128xf32>
    %31 = arith.select %29, %22, %30 : vector<1x128xi1>, vector<1x128xf32>
    %32 = vector.broadcast %7 : f32 to vector<1x128xf32>
    %33 = arith.mulf %32, %31 : vector<1x128xf32>
    %34 = arith.addf %21, %33 : vector<1x128xf32>
    %c3_i32_27 = arith.constant 3 : i32
    %35 = tpu.dynamic_rotate %5 by %c3_i32_27 dim 1 : vector<1x128xf32>, i32 -> vector<1x128xf32>
    %c-3_i32_28 = arith.constant -3 : i32
    %36 = vector.broadcast %c-3_i32_28 : i32 to vector<1x128xi32>
    %37 = arith.addi %6, %36 : vector<1x128xi32>
    %c0_i32_29 = arith.constant 0 : i32
    %38 = vector.broadcast %c0_i32_29 : i32 to vector<1x128xi32>
    %39 = arith.cmpi sge, %37, %38 : vector<1x128xi32>
    %c16_i32_30 = arith.constant 16 : i32
    %40 = vector.broadcast %c16_i32_30 : i32 to vector<1x128xi32>
    %41 = arith.cmpi slt, %37, %40 : vector<1x128xi32>
    %42 = arith.andi %39, %41 : vector<1x128xi1>
    %cst_31 = arith.constant 0.000000e+00 : f32
    %43 = vector.broadcast %cst_31 : f32 to vector<1x128xf32>
    %44 = arith.select %42, %35, %43 : vector<1x128xi1>, vector<1x128xf32>
    %45 = vector.broadcast %14 : f32 to vector<1x128xf32>
    %46 = arith.mulf %45, %44 : vector<1x128xf32>
    %47 = arith.addf %34, %46 : vector<1x128xf32>
    %c2_i32 = arith.constant 2 : i32
    %48 = tpu.dynamic_rotate %3 by %c2_i32 dim 1 : vector<1x128xf32>, i32 -> vector<1x128xf32>
    %c-2_i32 = arith.constant -2 : i32
    %49 = vector.broadcast %c-2_i32 : i32 to vector<1x128xi32>
    %50 = arith.addi %6, %49 : vector<1x128xi32>
    %c0_i32_32 = arith.constant 0 : i32
    %51 = vector.broadcast %c0_i32_32 : i32 to vector<1x128xi32>
    %52 = arith.cmpi sge, %50, %51 : vector<1x128xi32>
    %c16_i32_33 = arith.constant 16 : i32
    %53 = vector.broadcast %c16_i32_33 : i32 to vector<1x128xi32>
    %54 = arith.cmpi slt, %50, %53 : vector<1x128xi32>
    %55 = arith.andi %52, %54 : vector<1x128xi1>
    %cst_34 = arith.constant 0.000000e+00 : f32
    %56 = vector.broadcast %cst_34 : f32 to vector<1x128xf32>
    %57 = arith.select %55, %48, %56 : vector<1x128xi1>, vector<1x128xf32>
    %58 = vector.broadcast %8 : f32 to vector<1x128xf32>
    %59 = arith.mulf %58, %57 : vector<1x128xf32>
    %60 = arith.addf %47, %59 : vector<1x128xf32>
    %c2_i32_35 = arith.constant 2 : i32
    %61 = tpu.dynamic_rotate %5 by %c2_i32_35 dim 1 : vector<1x128xf32>, i32 -> vector<1x128xf32>
    %c-2_i32_36 = arith.constant -2 : i32
    %62 = vector.broadcast %c-2_i32_36 : i32 to vector<1x128xi32>
    %63 = arith.addi %6, %62 : vector<1x128xi32>
    %c0_i32_37 = arith.constant 0 : i32
    %64 = vector.broadcast %c0_i32_37 : i32 to vector<1x128xi32>
    %65 = arith.cmpi sge, %63, %64 : vector<1x128xi32>
    %c16_i32_38 = arith.constant 16 : i32
    %66 = vector.broadcast %c16_i32_38 : i32 to vector<1x128xi32>
    %67 = arith.cmpi slt, %63, %66 : vector<1x128xi32>
    %68 = arith.andi %65, %67 : vector<1x128xi1>
    %cst_39 = arith.constant 0.000000e+00 : f32
    %69 = vector.broadcast %cst_39 : f32 to vector<1x128xf32>
    %70 = arith.select %68, %61, %69 : vector<1x128xi1>, vector<1x128xf32>
    %71 = vector.broadcast %15 : f32 to vector<1x128xf32>
    %72 = arith.mulf %71, %70 : vector<1x128xf32>
    %73 = arith.addf %60, %72 : vector<1x128xf32>
    %c1_i32 = arith.constant 1 : i32
    %74 = tpu.dynamic_rotate %3 by %c1_i32 dim 1 : vector<1x128xf32>, i32 -> vector<1x128xf32>
    %c-1_i32 = arith.constant -1 : i32
    %75 = vector.broadcast %c-1_i32 : i32 to vector<1x128xi32>
    %76 = arith.addi %6, %75 : vector<1x128xi32>
    %c0_i32_40 = arith.constant 0 : i32
    %77 = vector.broadcast %c0_i32_40 : i32 to vector<1x128xi32>
    %78 = arith.cmpi sge, %76, %77 : vector<1x128xi32>
    %c16_i32_41 = arith.constant 16 : i32
    %79 = vector.broadcast %c16_i32_41 : i32 to vector<1x128xi32>
    %80 = arith.cmpi slt, %76, %79 : vector<1x128xi32>
    %81 = arith.andi %78, %80 : vector<1x128xi1>
    %cst_42 = arith.constant 0.000000e+00 : f32
    %82 = vector.broadcast %cst_42 : f32 to vector<1x128xf32>
    %83 = arith.select %81, %74, %82 : vector<1x128xi1>, vector<1x128xf32>
    %84 = vector.broadcast %9 : f32 to vector<1x128xf32>
    %85 = arith.mulf %84, %83 : vector<1x128xf32>
    %86 = arith.addf %73, %85 : vector<1x128xf32>
    %c1_i32_43 = arith.constant 1 : i32
    %87 = tpu.dynamic_rotate %5 by %c1_i32_43 dim 1 : vector<1x128xf32>, i32 -> vector<1x128xf32>
    %c-1_i32_44 = arith.constant -1 : i32
    %88 = vector.broadcast %c-1_i32_44 : i32 to vector<1x128xi32>
    %89 = arith.addi %6, %88 : vector<1x128xi32>
    %c0_i32_45 = arith.constant 0 : i32
    %90 = vector.broadcast %c0_i32_45 : i32 to vector<1x128xi32>
    %91 = arith.cmpi sge, %89, %90 : vector<1x128xi32>
    %c16_i32_46 = arith.constant 16 : i32
    %92 = vector.broadcast %c16_i32_46 : i32 to vector<1x128xi32>
    %93 = arith.cmpi slt, %89, %92 : vector<1x128xi32>
    %94 = arith.andi %91, %93 : vector<1x128xi1>
    %cst_47 = arith.constant 0.000000e+00 : f32
    %95 = vector.broadcast %cst_47 : f32 to vector<1x128xf32>
    %96 = arith.select %94, %87, %95 : vector<1x128xi1>, vector<1x128xf32>
    %97 = vector.broadcast %16 : f32 to vector<1x128xf32>
    %98 = arith.mulf %97, %96 : vector<1x128xf32>
    %99 = arith.addf %86, %98 : vector<1x128xf32>
    %100 = vector.broadcast %10 : f32 to vector<1x128xf32>
    %101 = arith.mulf %100, %3 : vector<1x128xf32>
    %102 = arith.addf %99, %101 : vector<1x128xf32>
    %103 = vector.broadcast %17 : f32 to vector<1x128xf32>
    %104 = arith.mulf %103, %5 : vector<1x128xf32>
    %105 = arith.addf %102, %104 : vector<1x128xf32>
    %c127_i32 = arith.constant 127 : i32
    %106 = tpu.dynamic_rotate %3 by %c127_i32 dim 1 : vector<1x128xf32>, i32 -> vector<1x128xf32>
    %c1_i32_48 = arith.constant 1 : i32
    %107 = vector.broadcast %c1_i32_48 : i32 to vector<1x128xi32>
    %108 = arith.addi %6, %107 : vector<1x128xi32>
    %c0_i32_49 = arith.constant 0 : i32
    %109 = vector.broadcast %c0_i32_49 : i32 to vector<1x128xi32>
    %110 = arith.cmpi sge, %108, %109 : vector<1x128xi32>
    %c16_i32_50 = arith.constant 16 : i32
    %111 = vector.broadcast %c16_i32_50 : i32 to vector<1x128xi32>
    %112 = arith.cmpi slt, %108, %111 : vector<1x128xi32>
    %113 = arith.andi %110, %112 : vector<1x128xi1>
    %cst_51 = arith.constant 0.000000e+00 : f32
    %114 = vector.broadcast %cst_51 : f32 to vector<1x128xf32>
    %115 = arith.select %113, %106, %114 : vector<1x128xi1>, vector<1x128xf32>
    %116 = vector.broadcast %11 : f32 to vector<1x128xf32>
    %117 = arith.mulf %116, %115 : vector<1x128xf32>
    %118 = arith.addf %105, %117 : vector<1x128xf32>
    %c127_i32_52 = arith.constant 127 : i32
    %119 = tpu.dynamic_rotate %5 by %c127_i32_52 dim 1 : vector<1x128xf32>, i32 -> vector<1x128xf32>
    %c1_i32_53 = arith.constant 1 : i32
    %120 = vector.broadcast %c1_i32_53 : i32 to vector<1x128xi32>
    %121 = arith.addi %6, %120 : vector<1x128xi32>
    %c0_i32_54 = arith.constant 0 : i32
    %122 = vector.broadcast %c0_i32_54 : i32 to vector<1x128xi32>
    %123 = arith.cmpi sge, %121, %122 : vector<1x128xi32>
    %c16_i32_55 = arith.constant 16 : i32
    %124 = vector.broadcast %c16_i32_55 : i32 to vector<1x128xi32>
    %125 = arith.cmpi slt, %121, %124 : vector<1x128xi32>
    %126 = arith.andi %123, %125 : vector<1x128xi1>
    %cst_56 = arith.constant 0.000000e+00 : f32
    %127 = vector.broadcast %cst_56 : f32 to vector<1x128xf32>
    %128 = arith.select %126, %119, %127 : vector<1x128xi1>, vector<1x128xf32>
    %129 = vector.broadcast %18 : f32 to vector<1x128xf32>
    %130 = arith.mulf %129, %128 : vector<1x128xf32>
    %131 = arith.addf %118, %130 : vector<1x128xf32>
    %c126_i32 = arith.constant 126 : i32
    %132 = tpu.dynamic_rotate %3 by %c126_i32 dim 1 : vector<1x128xf32>, i32 -> vector<1x128xf32>
    %c2_i32_57 = arith.constant 2 : i32
    %133 = vector.broadcast %c2_i32_57 : i32 to vector<1x128xi32>
    %134 = arith.addi %6, %133 : vector<1x128xi32>
    %c0_i32_58 = arith.constant 0 : i32
    %135 = vector.broadcast %c0_i32_58 : i32 to vector<1x128xi32>
    %136 = arith.cmpi sge, %134, %135 : vector<1x128xi32>
    %c16_i32_59 = arith.constant 16 : i32
    %137 = vector.broadcast %c16_i32_59 : i32 to vector<1x128xi32>
    %138 = arith.cmpi slt, %134, %137 : vector<1x128xi32>
    %139 = arith.andi %136, %138 : vector<1x128xi1>
    %cst_60 = arith.constant 0.000000e+00 : f32
    %140 = vector.broadcast %cst_60 : f32 to vector<1x128xf32>
    %141 = arith.select %139, %132, %140 : vector<1x128xi1>, vector<1x128xf32>
    %142 = vector.broadcast %12 : f32 to vector<1x128xf32>
    %143 = arith.mulf %142, %141 : vector<1x128xf32>
    %144 = arith.addf %131, %143 : vector<1x128xf32>
    %c126_i32_61 = arith.constant 126 : i32
    %145 = tpu.dynamic_rotate %5 by %c126_i32_61 dim 1 : vector<1x128xf32>, i32 -> vector<1x128xf32>
    %c2_i32_62 = arith.constant 2 : i32
    %146 = vector.broadcast %c2_i32_62 : i32 to vector<1x128xi32>
    %147 = arith.addi %6, %146 : vector<1x128xi32>
    %c0_i32_63 = arith.constant 0 : i32
    %148 = vector.broadcast %c0_i32_63 : i32 to vector<1x128xi32>
    %149 = arith.cmpi sge, %147, %148 : vector<1x128xi32>
    %c16_i32_64 = arith.constant 16 : i32
    %150 = vector.broadcast %c16_i32_64 : i32 to vector<1x128xi32>
    %151 = arith.cmpi slt, %147, %150 : vector<1x128xi32>
    %152 = arith.andi %149, %151 : vector<1x128xi1>
    %cst_65 = arith.constant 0.000000e+00 : f32
    %153 = vector.broadcast %cst_65 : f32 to vector<1x128xf32>
    %154 = arith.select %152, %145, %153 : vector<1x128xi1>, vector<1x128xf32>
    %155 = vector.broadcast %19 : f32 to vector<1x128xf32>
    %156 = arith.mulf %155, %154 : vector<1x128xf32>
    %157 = arith.addf %144, %156 : vector<1x128xf32>
    %c125_i32 = arith.constant 125 : i32
    %158 = tpu.dynamic_rotate %3 by %c125_i32 dim 1 : vector<1x128xf32>, i32 -> vector<1x128xf32>
    %c3_i32_66 = arith.constant 3 : i32
    %159 = vector.broadcast %c3_i32_66 : i32 to vector<1x128xi32>
    %160 = arith.addi %6, %159 : vector<1x128xi32>
    %c0_i32_67 = arith.constant 0 : i32
    %161 = vector.broadcast %c0_i32_67 : i32 to vector<1x128xi32>
    %162 = arith.cmpi sge, %160, %161 : vector<1x128xi32>
    %c16_i32_68 = arith.constant 16 : i32
    %163 = vector.broadcast %c16_i32_68 : i32 to vector<1x128xi32>
    %164 = arith.cmpi slt, %160, %163 : vector<1x128xi32>
    %165 = arith.andi %162, %164 : vector<1x128xi1>
    %cst_69 = arith.constant 0.000000e+00 : f32
    %166 = vector.broadcast %cst_69 : f32 to vector<1x128xf32>
    %167 = arith.select %165, %158, %166 : vector<1x128xi1>, vector<1x128xf32>
    %168 = vector.broadcast %13 : f32 to vector<1x128xf32>
    %169 = arith.mulf %168, %167 : vector<1x128xf32>
    %170 = arith.addf %157, %169 : vector<1x128xf32>
    %c125_i32_70 = arith.constant 125 : i32
    %171 = tpu.dynamic_rotate %5 by %c125_i32_70 dim 1 : vector<1x128xf32>, i32 -> vector<1x128xf32>
    %c3_i32_71 = arith.constant 3 : i32
    %172 = vector.broadcast %c3_i32_71 : i32 to vector<1x128xi32>
    %173 = arith.addi %6, %172 : vector<1x128xi32>
    %c0_i32_72 = arith.constant 0 : i32
    %174 = vector.broadcast %c0_i32_72 : i32 to vector<1x128xi32>
    %175 = arith.cmpi sge, %173, %174 : vector<1x128xi32>
    %c16_i32_73 = arith.constant 16 : i32
    %176 = vector.broadcast %c16_i32_73 : i32 to vector<1x128xi32>
    %177 = arith.cmpi slt, %173, %176 : vector<1x128xi32>
    %178 = arith.andi %175, %177 : vector<1x128xi1>
    %cst_74 = arith.constant 0.000000e+00 : f32
    %179 = vector.broadcast %cst_74 : f32 to vector<1x128xf32>
    %180 = arith.select %178, %171, %179 : vector<1x128xi1>, vector<1x128xf32>
    %181 = vector.broadcast %20 : f32 to vector<1x128xf32>
    %182 = arith.mulf %181, %180 : vector<1x128xf32>
    %183 = arith.addf %170, %182 : vector<1x128xf32>
    %184 = arith.negf %183 : vector<1x128xf32>
    %185 = math.exp %184 : vector<1x128xf32>
    %cst_75 = arith.constant 1.000000e+00 : f32
    %186 = vector.broadcast %cst_75 : f32 to vector<1x128xf32>
    %187 = arith.addf %186, %185 : vector<1x128xf32>
    %188 = arith.divf %186, %187 : vector<1x128xf32>
    %189 = vector.broadcast %188 : vector<1x128xf32> to vector<4x128xf32>
    %190 = arith.mulf %189, %1 : vector<4x128xf32>
    %c0_76 = arith.constant 0 : index
    %c0_77 = arith.constant 0 : index
    %c0_78 = arith.constant 0 : index
    %191 = vector.load %arg3[%c0_76, %c0_77, %c0_78] : memref<1x4x128xf32, #tpu.memory_space<vmem>>, vector<1x4x128xf32>
    %192 = vector.shape_cast %191 : vector<1x4x128xf32> to vector<4x128xf32>
    %193 = vector.shape_cast %190 : vector<4x128xf32> to vector<1x4x128xf32>
    tpu.vector_store %arg3[%c0_76, %c0_77, %c0_78], %193 {strides = array<i32>} : memref<1x4x128xf32, #tpu.memory_space<vmem>>, vector<1x4x128xf32>,
    return
  }
  func.func @transform_0(%arg0: i32) -> (i32, i32) {
    %c0_i32 = arith.constant 0 : i32
    %c0_i32_0 = arith.constant 0 : i32
    %c0_i32_1 = arith.constant 0 : i32
    return %c0_i32, %c0_i32_0 : i32, i32
  }
  func.func @transform_1(%arg0: i32) -> (i32, i32, i32) {
    %c0_i32 = arith.constant 0 : i32
    %c0_i32_0 = arith.constant 0 : i32
    %c0_i32_1 = arith.constant 0 : i32
    return %arg0, %c0_i32, %c0_i32_0 : i32, i32, i32
  }
  func.func @transform_2(%arg0: i32) -> (i32, i32, i32) {
    %c0_i32 = arith.constant 0 : i32
    %c0_i32_0 = arith.constant 0 : i32
    %c0_i32_1 = arith.constant 0 : i32
    return %arg0, %c0_i32, %c0_i32_0 : i32, i32, i32
  }
}

</mosaic_0001>

<bundles_post_ra>
// kernel: tpu_custom_call.1
= control target key start
LH: loop header
LB: loop body
LE: loop exit
PB: predicated region body
PF: predicated region fallthrough
CT: control target
= control target key end

     0   :  { %7 = vsyncpa [#allocation5], 0  ;;  %s882_s0 = inlined_call_operand.hbm [shape: f32[2,7], index: 0, kind: input, shape index: {}]   ;;  %s883_s1 = inlined_call_operand.hbm [shape: f32[2,4,128], index: 1, kind: input, shape index: {}]   ;;  %s884_s2 = inlined_call_operand.hbm [shape: f32[2,4,128], index: 2, kind: output, shape index: {}]  }
   0x1   :  { %8 = vsyncpa [#allocation3], 0 }
   0x2   :  { %10 = vsyncpa [#allocation3 + $0x1], 0 }
   0x3   :  { %11 = vsyncpa [#allocation4], 0 }
   0x4   :  { %13 = vsyncpa [#allocation4 + $0x1], 0  ;;  %s641_s9 = smov 0   ;;  %s643_s10 = smov 0  }
   0x5   :  { %s645_s11 = smov 0   ;;  %s647_s12 = smov 0  }
   0x6 LB: > { %s662_s13 = sadd.s32 4294967295, %s615_s12   ;;  %s413_s14 = sadd.s32 4294967294, %s615_s12   ;;  %s615_s12 = sphi %s647_s12, %s910_s12   ;;  %s611_s11 = sphi %s645_s11, %s909_s11   ;;  %s607_s10 = sphi %s643_s10, %s908_s10   ;;  %s603_s9 = sphi %s641_s9, %s907_s9  }
   0x7   : > { %p60_p0 = scmp.ne.s32.totalorder %s607_s10, %s603_s9  ;;  %p885_p1 = scmp.eq.s32.totalorder %s662_s13, 0 }
   0x8   : > { %p84_p2 = scmp.eq.s32.totalorder %s662_s13, 1  ;;  %p90_p3 = scmp.eq.s32.totalorder %s413_s14, 1 }
   0x9   : > { %p671_p4 = por %p885_p1, %p60_p0  ;;  %p414_p5 = scmp.ge.s32.totalorder %s615_s12, 1 }
   0xa   : > { %p676_p6 = por %p90_p3, %p60_p0  ;;  %p97_p7 = scmp.lt.s32.totalorder %s615_s12, 3 }
   0xb   : > { %s889_s15 = scalar_select %p671_p4, 1, 0 }
   0xc   : > { %s890_s16 = scalar_select %p676_p6, 1, 0 }
   0xd   : > { %p681_p8 = pnand %p414_p5, %p97_p7  ;;  %s687_s18 = sadd.s32 1, %s615_s12  }
   0xe   : > { %s44_s19 = ssub.s32 %s615_s12, %s687_s18  ;;  %s47_s20 = sadd.s32 1, %s611_s11 }
   0xf   : > { %s891_s17 = scalar_select %p681_p8, 1, 0 }
  0x10   : > { %p449_p10 = pneg %p681_p8  ;;  %p45_p12 = scmp.eq.s32.totalorder %s44_s19, 0 }
  0x11   : > { %p54_p13 = scmp.ne.s32.totalorder %s611_s11, %s607_s10  ;;  %p55_p0 = scmp.eq.s32.totalorder %s615_s12, 0 }
  0x12   : > { %p450_p11 = pnand %p449_p10, %p885_p1  ;;  %p462_p3 = scmp.lt.s32.totalorder %s615_s12, 2 }
  0x13   : > { %s617_s21 = smov [#allocation2]   ;;  %p56_p5 = por %p55_p0, %p54_p13 }
  0x14   : > { %452 = dma.hbm_to_smem (!%p450_p11), %s882_s0, 32, %s617_s21, [#allocation5]  }
  0x15   : > { %s704_s24 = scalar_select %p45_p12, %s611_s11, %s47_s20  }
  0x16   : > { %p708_p7 = por %p84_p2, %p54_p13  ;;  %s119_s26 = sand.u32 1, %s611_s11  }
  0x17   : > { %s418_s27 = sshll.u32 %s615_s12, 6  ;;  %s417_s28 = sshll.u32 %s119_s26, 2 }
  0x18   : > { %s892_s25 = scalar_select %p708_p7, 1, 0 }
  0x19   : > { %s717_s3 = scalar_lea.hbm %s883_s1, %s418_s27  ;;  %s123_s4 = scalar_lea.vmem [#allocation6], %s417_s28 }
  0x1a   : > { %s130_s5 = sshll.u32 %s123_s4, 4  ;;  %p719_p10 = pnand %p462_p3, %p56_p5  ;;  %s131_s5 = int_to_ptr.vmem [resolvable:$true] %s130_s5 }
  0x1b   : > { %s120_s7 = scalar_lea.sflag [#allocation3], %s119_s26  ;;  %s519_s8 = scalar_lea.hbm %s717_s3, 64 }
  0x1c   : > { %p520_p2 = scmp.ne.s32.totalorder %s717_s3, %s519_s8  ;;  %p521_p11 = pneg %p719_p10 }
  0x1d   : > { %s524_s20 = scalar_lea.hbm %s883_s1, 128  ;;  %p525_p0 = scmp.lt.s32.totalorder %s717_s3, %s883_s1 }
  0x1e   : > { %p522_p12 = pnand %p521_p11, %p520_p2  ;;  %p526_p3 = scmp.lt.s32.totalorder %s524_s20, %s519_s8 }
  0x20   : > { %p523_p13 = pneg %p522_p12  ;;  %p527_p5 = por %p526_p3, %p525_p0 }
  0x22   : > { %p528_p9 = pnand %p527_p5, %p523_p13 }
  0x24   : > { %531 = shalt.err (!%p528_p9)
}
  0x25   : > { %s532_s23 = scalar_lea.vmem %s131_s5, 64  ;;  %s618_s26 = smov [#allocation6]  }
  0x26   : > { %p533_p1 = scmp.ne.s32.totalorder %s131_s5, %s532_s23  ;;  %s537_s27 = sshll.u32 %s618_s26, 4  ;;  %s538_s27 = int_to_ptr.vmem [resolvable:$false] %s537_s27 }
  0x27   : > { %s539_s28 = scalar_lea.vmem %s538_s27, 128  ;;  %p540_p2 = scmp.lt.s32.totalorder %s131_s5, %s538_s27 }
  0x28   : > { %p535_p6 = pnand %p533_p1, %p521_p11  ;;  %p541_p12 = scmp.lt.s32.totalorder %s539_s28, %s532_s23 }
  0x2a   : > { %p536_p7 = pneg %p535_p6  ;;  %p542_p4 = por %p541_p12, %p540_p2 }
  0x2c   : > { %p543_p8 = pnand %p542_p4, %p536_p7 }
  0x2e   : > { %546 = shalt.err (!%p543_p8)
}
  0x2f   : > { %456 = dma.hbm_to_vmem [thread:$0]  (!%p719_p10), %s717_s3, 64, %s131_s5, %s120_s7  }
  0x30   : > { %p894_p13 = scmp.ne.s32.totalorder %s891_s17, 0 }
  0x31   : > { %p895_p9 = scmp.eq.s32.totalorder (!%p894_p13), %s662_s13, 0 }
  0x32   : > { %139 = sbr.rel (%p894_p13) target bundleno = 273 (0x111), region = 28 }
  0x37   : > { %590 = dma.done.wait (%p895_p9), [#allocation5], 32   ;;  %p896_p1 = pmov %p895_p9 }
  0x38   : > { %s744_s29 = sand.u32 1, %s607_s10   ;;  %p897_p4 = scmp.ne.s32.totalorder %s889_s15, 0 }
  0x39   : > { %592 = vsyncadd (%p896_p1), [#allocation5], 4294967264  ;;  %s421_s30 = sshll.u32 %s744_s29, 2  ;;  %s146_s4 = scalar_lea.sflag [#allocation3], %s744_s29 }
  0x3a   : > { %s149_s3 = scalar_lea.vmem [#allocation6], %s421_s30 }
  0x3b   : > { %594 = dma.done.wait (%p897_p4), %s146_s4, 64  }
  0x3c   : > { %596 = vsyncadd (%p897_p4), %s146_s4, 4294967232 }
  0x3d   : > { %154 = sfence }
  0x3e   : > { %v754_v0 = vld [vmem:[%s149_s3] sm:$0xf]  ;;  %vm172_vm0 = vcmask 1043456   ;;  %s619_s15 = smov 3   ;;  %s620_s17 = smov 2   ;;  %v187_v15 = vlaneseq }
  0x3f   : > { %v173_v1 = vsel %vm172_vm0, %v754_v0, 0.0  ;;  %v180_v2 = vsel %vm172_vm0, %v754_v0, -inf  ;;  %s621_s5 = smov 1   ;;  %s622_s6 = smov 127  }
  0x40   : > { %v174_v3 = vrot.slane %v173_v1, 4  ;;  %v181_v4 = vrot.slane %v180_v2, 4  ;;  %s623_s7 = smov 126   ;;  %s624_s8 = smov 125   ;;  %v775_v16 = vand.u32 127, %v187_v15 }
  0x41   : > { %s189_s14 = sld [smem:[#allocation2]]  ;;  %p904_p8 = scmp.ne.s32.totalorder %s892_s25, 0 }
  0x42   : > { %v175_v5 = vadd.f32 %v174_v3, %v173_v1  ;;  %v182_v6 = vmax.f32 %v180_v2, %v181_v4  ;;  %v205_v17 = vadd.s32 4294967293, %v775_v16  ;;  %v221_v18 = vadd.s32 4294967294, %v775_v16  ;;  %s429_s19 = sld [smem:[#allocation2 + $0x80]] }
  0x43   : > { %s779_s20 = sld [smem:[#allocation2 + $0x1]]  ;;  %v237_v19 = vadd.s32 4294967295, %v775_v16  ;;  %v259_v43 = vadd.s32 1, %v775_v16  ;;  %v275_v54 = vadd.s32 2, %v775_v16  ;;  %v291_v1 = vadd.s32 3, %v775_v16 }
  0x44   : > { %v176_v7 = vrot.slane %v175_v5, 2  ;;  %v183_v8 = vrot.slane %v182_v6, 2  ;;  %vm206_vm1 = vcmp.ge.s32.totalorder %v205_v17, 0  ;;  %vm207_vm2 = vcmp.lt.s32.totalorder %v205_v17, 16  ;;  %s781_s21 = sld [smem:[#allocation2 + $0x81]] }
  0x45   : > { %vm222_vm3 = vcmp.ge.s32.totalorder %v221_v18, 0  ;;  %vm223_vm4 = vcmp.lt.s32.totalorder %v221_v18, 16  ;;  %s783_s22 = sld [smem:[#allocation2 + $0x2]]  ;;  %vm786_vm5 = vmand %vm206_vm1, %vm207_vm2  ;;  %vm238_vm7 = vcmp.ge.s32.totalorder %v237_v19, 0  ;;  %vm239_vm8 = vcmp.lt.s32.totalorder %v237_v19, 16 }
  0x46   : > { %v177_v9 = vadd.f32 %v176_v7, %v175_v5  ;;  %v184_v10 = vmax.f32 %v182_v6, %v183_v8  ;;  %s790_s23 = sld [smem:[#allocation2 + $0x82]]  ;;  %vm792_vm6 = vmand %vm222_vm3, %vm223_vm4  ;;  %vm261_vm10 = vcmp.lt.s32.totalorder %v259_v43, 16  ;;  %vm277_vm11 = vcmp.lt.s32.totalorder %v275_v54, 16 }
  0x47   : > { %v210_v23 = vstv %s189_s14  ;;  %s798_s26 = sld [smem:[#allocation2 + $0x3]]  ;;  %vm810_vm9 = vmand %vm238_vm7, %vm239_vm8  ;;  %vm293_vm12 = vcmp.lt.s32.totalorder %v291_v1, 16 }
  0x48   : > { %v178_v11 = vrot.slane %v177_v9, 1  ;;  %v185_v12 = vrot.slane %v184_v10, 1  ;;  %v216_v26 = vstv %s429_s19  ;;  %s808_s27 = sld [smem:[#allocation2 + $0x83]] }
  0x49   : > { %v226_v27 = vstv %s779_s20  ;;  %s815_s28 = sld [smem:[#allocation2 + $0x4]] }
  0x4a   : > { %v758_v13 = vadd.f32 %v178_v11, %v177_v9  ;;  %v762_v14 = vmax.f32 %v184_v10, %v185_v12  ;;  %v232_v32 = vstv %s781_s21  ;;  %s823_s4 = sld [smem:[#allocation2 + $0x84]]  ;;  %s318_s21 = scalar_lea.sflag [#allocation4], %s744_s29 }
  0x4b   : > { %v242_v37 = vstv %s783_s22  ;;  %s826_s3 = sld [smem:[#allocation2 + $0x5]] }
  0x4c   : > { %203 = vrot.lane.b32.xlu0 %v758_v13, %s619_s15  ;;  %219 = vrot.lane.b32.xlu1 %v758_v13, %s620_s17  ;;  %v248_v45 = vstv %s790_s23  ;;  %s625_s23 = smov [#allocation7]  }
  0x4d   : > { %v251_v49 = vstv %s798_s26 }
  0x4e   : > { %v254_v55 = vstv %s808_s27  ;;  %v252_v57 = vmul.f32 %v251_v49, %v758_v13 }
  0x4f   : > { %v264_v58 = vstv %s815_s28  ;;  %v255_v61 = vmul.f32 %v254_v55, %v762_v14 }
  0x50   : > { %213 = vrot.lane.b32.xlu0 %v762_v14, %s619_s15  ;;  %229 = vrot.lane.b32.xlu1 %v762_v14, %s620_s17  ;;  %s830_s15 = sld [smem:[#allocation2 + $0x85]]  ;;  %v270_v2 = vstv %s823_s4 }
  0x51   : > { %s428_s17 = sld [smem:[#allocation2 + $0x6]]  ;;  %v280_v6 = vstv %s826_s3 }
  0x54   : > { %235 = vrot.lane.b32.xlu0 %v758_v13, %s621_s5  ;;  %245 = vrot.lane.b32.xlu1 %v762_v14, %s621_s5  ;;  %s435_s5 = sld [smem:[#allocation2 + $0x86]] }
  0x56   : > { %v286_v11 = vstv %s830_s15 }
  0x57   : > { %v296_v16 = vstv %s428_s17 }
  0x58   : > { %257 = vrot.lane.b32.xlu0 %v758_v13, %s622_s6  ;;  %267 = vrot.lane.b32.xlu1 %v762_v14, %s622_s6  ;;  %s438_s6 = sshll.u32 %s662_s13, 6  ;;  %s551_s13 = sshll.u32 %s625_s23, 4  ;;  %s552_s13 = int_to_ptr.vmem [resolvable:$false] %s551_s13 }
  0x59   : > { %s329_s20 = scalar_lea.hbm %s884_s2, %s438_s6 }
  0x5c   : > { %273 = vrot.lane.b32.xlu0 %v758_v13, %s623_s7  ;;  %283 = vrot.lane.b32.xlu1 %v762_v14, %s623_s7  ;;  %s170_s7 = scalar_lea.vmem [#allocation7], %s421_s30  ;;  %s553_s30 = scalar_lea.vmem %s552_s13, 128 }
  0x60   : > { %289 = vrot.lane.b32.xlu0 %v758_v13, %s624_s8  ;;  %299 = vrot.lane.b32.xlu1 %v762_v14, %s624_s8  ;;  %s331_s8 = sshll.u32 %s170_s7, 4  ;;  %s332_s8 = int_to_ptr.vmem [resolvable:$true] %s331_s8 }
  0x61   : > { %s547_s22 = scalar_lea.vmem %s332_s8, 64  ;;  %p554_p11 = scmp.lt.s32.totalorder %s332_s8, %s552_s13 }
  0x62   : > { %p548_p6 = scmp.ne.s32.totalorder %s332_s8, %s547_s22  ;;  %p555_p0 = scmp.lt.s32.totalorder %s553_s30, %s547_s22 }
  0x64   : > { %p549_p7 = pnand %p548_p6, %p904_p8  ;;  %p556_p3 = por %p555_p0, %p554_p11 }
  0x66   : > { %p550_p10 = pneg %p549_p7 }
  0x68   : > { %p557_p5 = pnand %p556_p3, %p550_p10 }
  0xbe   : > { %v204_v21 = vpop.permute.xlu0 %203  ;;  %v220_v22 = vpop.permute.xlu1 %219 }
  0xbf   : > { %v209_v25 = vsel %vm786_vm5, %v204_v21, 0.0  ;;  %v225_v30 = vsel %vm792_vm6, %v220_v22, 0.0  ;;  %v302_v21 = vstv %s435_s5 }
  0xc0   : > { %v211_v34 = vmul.f32 %v210_v23, %v209_v25  ;;  %v227_v38 = vmul.f32 %v226_v27, %v225_v30 }
  0xc2   : > { %v214_v28 = vpop.permute.xlu0 %213  ;;  %v230_v29 = vpop.permute.xlu1 %229 }
  0xc3   : > { %v215_v31 = vsel %vm786_vm5, %v214_v28, 0.0  ;;  %v231_v33 = vsel %vm792_vm6, %v230_v29, 0.0 }
  0xc4   : > { %v217_v35 = vmul.f32 %v216_v26, %v215_v31  ;;  %v233_v40 = vmul.f32 %v232_v32, %v231_v33  ;;  %v312_v32 = vshrl.u32 %v187_v15, 7 }
  0xc6   : > { %v218_v39 = vadd.f32 %v217_v35, %v211_v34  ;;  %v236_v41 = vpop.permute.xlu0 %235  ;;  %v246_v42 = vpop.permute.xlu1 %245  ;;  %v313_v33 = vsub.s32 0, %v312_v32 }
  0xc7   : > { %v241_v44 = vsel %vm810_vm9, %v236_v41, 0.0  ;;  %v247_v46 = vsel %vm810_vm9, %v246_v42, 0.0 }
  0xc8   : > { %v228_v47 = vadd.f32 %v227_v38, %v218_v39  ;;  %v243_v48 = vmul.f32 %v242_v37, %v241_v44  ;;  %v249_v51 = vmul.f32 %v248_v45, %v247_v46 }
  0xca   : > { %v234_v50 = vadd.f32 %v233_v40, %v228_v47  ;;  %v258_v52 = vpop.permute.xlu0 %257  ;;  %v268_v53 = vpop.permute.xlu1 %267 }
  0xcb   : > { %v263_v59 = vsel %vm261_vm10, %v258_v52, 0.0  ;;  %v269_v3 = vsel %vm261_vm10, %v268_v53, 0.0 }
  0xcc   : > { %v244_v56 = vadd.f32 %v243_v48, %v234_v50  ;;  %v265_v5 = vmul.f32 %v264_v58, %v263_v59  ;;  %v271_v9 = vmul.f32 %v270_v2, %v269_v3 }
  0xce   : > { %v250_v60 = vadd.f32 %v249_v51, %v244_v56  ;;  %v274_v62 = vpop.permute.xlu0 %273  ;;  %v284_v63 = vpop.permute.xlu1 %283 }
  0xcf   : > { %v279_v7 = vsel %vm277_vm11, %v274_v62, 0.0  ;;  %v285_v12 = vsel %vm277_vm11, %v284_v63, 0.0 }
  0xd0   : > { %v253_v4 = vadd.f32 %v252_v57, %v250_v60  ;;  %v281_v14 = vmul.f32 %v280_v6, %v279_v7  ;;  %v287_v20 = vmul.f32 %v286_v11, %v285_v12 }
  0xd2   : > { %v256_v8 = vadd.f32 %v255_v61, %v253_v4  ;;  %v290_v10 = vpop.permute.xlu0 %289  ;;  %v300_v17 = vpop.permute.xlu1 %299 }
  0xd3   : > { %v295_v18 = vsel %vm293_vm12, %v290_v10, 0.0  ;;  %v301_v22 = vsel %vm293_vm12, %v300_v17, 0.0 }
  0xd4   : > { %v266_v13 = vadd.f32 %v265_v5, %v256_v8  ;;  %v297_v24 = vmul.f32 %v296_v16, %v295_v18  ;;  %v303_v26 = vmul.f32 %v302_v21, %v301_v22 }
  0xd6   : > { %v272_v19 = vadd.f32 %v271_v9, %v266_v13 }
  0xd8   : > { %v282_v23 = vadd.f32 %v281_v14, %v272_v19 }
  0xda   : > { %v288_v25 = vadd.f32 %v287_v20, %v282_v23 }
  0xdc   : > { %v298_v27 = vadd.f32 %v297_v24, %v288_v25 }
  0xde   : > { %v304_v28 = vadd.f32 %v303_v26, %v298_v27 }
  0xe0   : > { %v436_v29 = vmul.f32 -1.442695, %v304_v28 }
  0xe2   : > { %504 = vpow2.f32 %v436_v29 }
  0xef   : > { %v505_v30 = vpop.eup %504 }
  0xf0   : > { %v308_v31 = vadd.f32 1.0, %v505_v30 }
  0xf2   : > { %506 = vrcp.f32 %v308_v31 }
  0xff   : > { %v507_v34 = vpop.eup %506 }
 0x100   : > { %v314_v35 = vrot.slane %v507_v34, %v313_v33 }
 0x102   : > { %v315_v36 = vmul.f32 %v314_v35, %v754_v0 }
 0x104   : > { %316 = vst [vmem:[%s170_s7] sm:$0xf] %v315_v36 }
 0x105   : > { %560 = shalt.err (!%p557_p5)
}
 0x106   : > { %s561_s26 = scalar_lea.hbm %s329_s20, 64  ;;  %s565_s28 = scalar_lea.hbm %s884_s2, 128 }
 0x107   : > { %p562_p2 = scmp.ne.s32.totalorder %s329_s20, %s561_s26  ;;  %p566_p9 = scmp.lt.s32.totalorder %s329_s20, %s884_s2 }
 0x108   : > { %p567_p1 = scmp.lt.s32.totalorder %s565_s28, %s561_s26 }
 0x109   : > { %p563_p12 = pnand %p562_p2, %p904_p8 }
 0x10a   : > { %p568_p4 = por %p567_p1, %p566_p9 }
 0x10b   : > { %p564_p13 = pneg %p563_p12 }
 0x10d   : > { %p569_p6 = pnand %p568_p4, %p564_p13 }
 0x10f   : > { %572 = shalt.err (!%p569_p6)
}
 0x110   : > { %447 = dma.vmem_to_hbm [thread:$0]  (%p904_p8), %s332_s8, 64, %s329_s20, %s318_s21  }
 0x111 PF: > { %s343_s15 = sand.u32 1, %s603_s9   ;;  %p905_p7 = scmp.ne.s32.totalorder %s890_s16, 0 }
 0x112   : > { %p906_p10 = scmp.ge.s32.totalorder %s615_s12, 2  ;;  %s344_s17 = scalar_lea.sflag [#allocation4], %s343_s15 }
 0x114   : > { %p458_p11 = pnand %p906_p10, %p905_p7 }
 0x116   : > { %p459_p0 = pneg %p458_p11 }
 0x118   : > { %598 = dma.done.wait (%p459_p0), %s344_s17, 64  }
 0x119   : > { %600 = vsyncadd (%p459_p0), %s344_s17, 4294967232  ;;  %p16_p3 = scmp.ge.s32.totalorder %s687_s18, 4   ;;  %s907_s9 = smov %s607_s10 }
 0x11a   : > { %s908_s10 = smov %s611_s11  ;;  %s909_s11 = smov %s704_s24 }
 0x11b   : > { %s910_s12 = smov %s687_s18  ;;  %18 = sbr.rel (!%p16_p3) target bundleno = 6 (0x6), region = 78 }
 0x120   :  { %349 = vsyncpa [#allocation3], 1 }
 0x121   :  { %351 = vsyncpa [#allocation3 + $0x1], 1 }
 0x122   :  { %352 = vsyncpa [#allocation4], 1 }
 0x123   :  { %354 = vsyncpa [#allocation4 + $0x1], 1 }
 0x124   :  { %355 = vsyncpa [#allocation5], 1 }
 0x125   :  { %357 = vsyncpa [#allocation5 + $0x1], 1 }

</bundles_post_ra>
